<compile_context>
chip_gen: v5e
topology: v5e:2x2
jax: 0.10.0
libtpu: 0.0.40
codegen_flags: <defaults>
</compile_context>

<pallas_src>
import functools
import math

import jax
import jax.numpy as jnp
from jax.experimental import pallas as pl
from jax.experimental.pallas import tpu as pltpu


_HALF_LOG_2PI = 0.5 * math.log(2.0 * math.pi)


def _policy_loss_kernel(d_ref, mu_ref, sigma_ref, out_ref, acc_ref, *,
                        DP, B, tb, steps, first_masked_tile, need_mask):
    j = pl.program_id(0)          # shard ("parallel"; one per TensorCore on v7x)
    i = pl.program_id(1)          # reduction step within the shard ("arbitrary")
    tile = j * steps + i          # un-clamped logical batch-tile index

    @pl.when(i == 0)
    def _():
        acc_ref[...] = jnp.zeros_like(acc_ref)

    d = d_ref[...].astype(jnp.float32)        # (tb, 2*DP): [:, :DP]=x, [:, DP:]=w
    x = d[:, :DP]                             # DP % 128 == 0 -> lane-aligned split
    w = d[:, DP:]
    mu = mu_ref[...].astype(jnp.float32)
    sigma = sigma_ref[...].astype(jnp.float32)

    # EUP vrcp seed + one Newton-Raphson refinement (2 cheap VALU ops).  Keeps
    # the reciprocal genuinely on the EUP slot while preserving f32-level
    # accuracy (VALU has ample slack: the kernel is HBM-bound).
    inv_sigma = pl.reciprocal(sigma, approx=True)
    inv_sigma = inv_sigma * (2.0 - sigma * inv_sigma)

    z = (x - mu) * inv_sigma
    term = (-0.5 * (z * z) - jnp.log(sigma) - _HALF_LOG_2PI) * w

    def _fold(t):
        # Fold the batch-tile rows into the (8, DP) accumulator using
        # sublane-aligned static slices: pure VALU adds, no reshape/XLU.
        folded = t[0:8, :]
        for g in range(1, tb // 8):
            folded = folded + t[g * 8:(g + 1) * 8, :]
        return folded

    if need_mask:
        is_partial = tile >= first_masked_tile

        @pl.when(jnp.logical_not(is_partial))
        def _():
            # Full tiles: no iota / compare / select on the hot path.
            acc_ref[...] += _fold(term)

        @pl.when(is_partial)
        def _():
            # Rows past B (tail of the last real tile, or a whole phantom tile
            # whose DMA index was clamped to the last tile) are zeroed with a
            # SELECT applied after the math, so garbage sigma (NaN/Inf from
            # log/recip) in out-of-bounds rows cannot propagate.
            row = tile * tb + jax.lax.broadcasted_iota(jnp.int32, (tb, DP), 0)
            acc_ref[...] += _fold(jnp.where(row < B, term, 0.0))
    else:
        acc_ref[...] += _fold(term)

    @pl.when(i == steps - 1)
    def _():
        s = jnp.sum(acc_ref[...])             # single small (8, DP) reduce / shard
        out_ref[...] = jnp.broadcast_to(s, out_ref.shape)


def _round_up(x, m):
    return ((x + m - 1) // m) * m


def policy_loss(data, mu, sigma, *, tb=None,
                vmem_budget_bytes=16 * 1024 * 1024):
    """data: (B, 2, D); mu, sigma: (B, D). Returns scalar f32 loss."""
    B, two, D = data.shape
    assert two == 2
    assert mu.shape == (B, D) and sigma.shape == (B, D)

    DP = _round_up(D, 128)
    if DP == D:
        # Free contiguous view: actions in columns [:D], weights in [D:].
        data2d = data.reshape(B, 2 * D)
        mu_p, sigma_p = mu, sigma
    else:
        # Lane-dense restructuring for D not a multiple of 128: pad the feature
        # axis so the column split stays on a lane-tile boundary.  Padded lanes
        # contribute exactly 0 (w = 0) and stay finite (sigma = 1).
        pad = DP - D
        x = jnp.pad(data[:, 0, :], ((0, 0), (0, pad)))
        w = jnp.pad(data[:, 1, :], ((0, 0), (0, pad)))
        data2d = jnp.concatenate([x, w], axis=1)
        mu_p = jnp.pad(mu, ((0, 0), (0, pad)))
        sigma_p = jnp.pad(sigma, ((0, 0), (0, pad)), constant_values=1.0)

    d_sz = data2d.dtype.itemsize
    m_sz = mu_p.dtype.itemsize
    s_sz = sigma_p.dtype.itemsize
    # Sublane multiple for the narrowest input dtype (f32: 8, bf16: 16, int8: 32).
    sub = max(32 // d_sz, 32 // m_sz, 32 // s_sz, 8)

    per_row = 2 * DP * d_sz + DP * m_sz + DP * s_sz   # HBM bytes / row / step
    if tb is None:
        # Big tiles amortize the ~0.35 us per-step pipeline overhead; the
        # factor 2 accounts for the double-buffered input windows.
        tb = vmem_budget_bytes // (2 * per_row)
    tb = max(sub, (tb // sub) * sub)
    tb = min(tb, _round_up(B, sub))

    n_tiles = pl.cdiv(B, tb)
    # Always split across 2 shards when there is more than one tile so both
    # TensorCores on v7x are engaged even for odd tile counts.
    n_shards = 2 if n_tiles >= 2 else 1
    steps = pl.cdiv(n_tiles, n_shards)
    first_masked_tile = (B // tb) if (B % tb) != 0 else n_tiles
    need_mask = (B % tb != 0) or (n_shards * steps > n_tiles)

    kernel = functools.partial(
        _policy_loss_kernel, DP=DP, B=B, tb=tb, steps=steps,
        first_masked_tile=first_masked_tile, need_mask=need_mask)

    def in_idx(j, i):
        # Clamp phantom tiles (odd tile counts split over 2 shards) so every
        # DMA stays in-bounds; their contribution is masked to zero in-kernel.
        return (jnp.minimum(j * steps + i, n_tiles - 1), 0)

    data_spec = pl.BlockSpec((tb, 2 * DP), in_idx)
    row_spec = pl.BlockSpec((tb, DP), in_idx)
    out_spec = pl.BlockSpec((8, 128), lambda j, i: (j, 0))

    # Real VMEM footprint: 2 pipeline buffers of the 3 input windows + the
    # (8, DP) f32 accumulator + output block + ~2 MiB slack.
    vmem_limit = 2 * tb * per_row + 8 * DP * 4 + 2 * 8 * 128 * 4 + (2 << 20)
    vmem_limit = int(min(max(vmem_limit, 4 << 20), 100 << 20))

    elems = B * D
    cost = pl.CostEstimate(
        flops=10 * elems,
        transcendentals=2 * elems,
        bytes_accessed=(data2d.size * d_sz + mu_p.size * m_sz
                        + sigma_p.size * s_sz + n_shards * 8 * 128 * 4))

    out = pl.pallas_call(
        kernel,
        out_shape=jax.ShapeDtypeStruct((8 * n_shards, 128), jnp.float32),
        grid_spec=pltpu.PrefetchScalarGridSpec(
            num_scalar_prefetch=0,
            grid=(n_shards, steps),
            in_specs=[data_spec, row_spec, row_spec],
            out_specs=out_spec,
            scratch_shapes=[pltpu.VMEM((8, DP), jnp.float32)],
        ),
        compiler_params=pltpu.CompilerParams(
            # TODO(synk): on v7x, if profiling shows one core running all
            # steps, switch axis 0 to pltpu.CORE_PARALLEL (kept "parallel"
            # here so the kernel also compiles on single-core v5e/v6e).
            dimension_semantics=("parallel", "arbitrary"),
            vmem_limit_bytes=vmem_limit,
        ),
        cost_estimate=cost,
    )(data2d, mu_p, sigma_p)

    partials = out[0::8, 0]                      # one partial sum per shard
    return jnp.sum(partials) / float(B * D)


def _reference(data, mu, sigma):
    x = data[:, 0, :]
    w = data[:, 1, :]
    z = (x - mu) / sigma
    log_prob = -0.5 * z * z - jnp.log(sigma) - _HALF_LOG_2PI
    return jnp.mean(log_prob * w)


if __name__ == "__main__":
    B, D = 60, 128
    key = jax.random.PRNGKey(0)
    k1, k2, k3 = jax.random.split(key, 3)

    data = jax.random.normal(k1, (B, 2, D), dtype=jnp.float32)
    mu = jax.random.normal(k2, (B, D), dtype=jnp.float32)
    # sigma must be positive
    sigma = jax.nn.softplus(jax.random.normal(k3, (B, D), dtype=jnp.float32)) + 0.1

    ref = _reference(data, mu, sigma)

    # 4 tiles -> 2 shards x 2 steps, last tile partially masked.
    loss_a = jax.block_until_ready(policy_loss(data, mu, sigma, tb=16))
    assert jnp.allclose(loss_a, ref, atol=1e-4, rtol=1e-4), (loss_a, ref)

    # 3 tiles (odd) -> 2 shards x 2 steps with one clamped + masked phantom tile.
    loss_b = jax.block_until_ready(policy_loss(data, mu, sigma, tb=24))
    assert jnp.allclose(loss_b, ref, atol=1e-4, rtol=1e-4), (loss_b, ref)

    # Auto-sized tile: single large tile, tail rows masked.
    loss_c = jax.block_until_ready(policy_loss(data, mu, sigma))
    assert jnp.allclose(loss_c, ref, atol=1e-4, rtol=1e-4), (loss_c, ref)

    # Non-128-multiple action dim -> lane-dense padding path.
    D2 = 40
    data2 = jax.random.normal(k1, (B, 2, D2), dtype=jnp.float32)
    mu2 = jax.random.normal(k2, (B, D2), dtype=jnp.float32)
    sigma2 = jax.nn.softplus(jax.random.normal(k3, (B, D2), dtype=jnp.float32)) + 0.1
    ref2 = _reference(data2, mu2, sigma2)
    loss_d = jax.block_until_ready(policy_loss(data2, mu2, sigma2))
    assert jnp.allclose(loss_d, ref2, atol=1e-4, rtol=1e-4), (loss_d, ref2)

    # bf16 inputs (halves HBM traffic); kernel upcasts to f32 internally.
    data_b = data.astype(jnp.bfloat16)
    mu_b = mu.astype(jnp.bfloat16)
    sigma_b = sigma.astype(jnp.bfloat16)
    ref_b = _reference(data_b.astype(jnp.float32), mu_b.astype(jnp.float32),
                       sigma_b.astype(jnp.float32))
    loss_e = jax.block_until_ready(policy_loss(data_b, mu_b, sigma_b))
    assert jnp.allclose(loss_e, ref_b, atol=1e-3, rtol=1e-3), (loss_e, ref_b)

    print("KERNEL_OK")
</pallas_src>

<mosaic_0001>
module attributes {stable_mosaic.version = 11 : i64} {
  func.func @_policy_loss_kernel(%arg0: i32, %arg1: i32, %arg2: memref<16x256xf32, #tpu.memory_space<vmem>>, %arg3: memref<16x128xf32, #tpu.memory_space<vmem>>, %arg4: memref<16x128xf32, #tpu.memory_space<vmem>>, %arg5: memref<8x128xf32, #tpu.memory_space<vmem>>, %arg6: memref<8x128xf32, #tpu.memory_space<vmem>>) attributes {dimension_semantics = [#tpu.dimension_semantics<parallel>, #tpu.dimension_semantics<arbitrary>], iteration_bounds = array<i64: 2, 2>, scalar_prefetch = 0 : i64, scratch_operands = 1 : i64, tpu.core_type = #tpu.core_type<tc>, window_params = [{transform_indices = @transform_0, window_bounds = array<i64: 16, 256>}, {transform_indices = @transform_1, window_bounds = array<i64: 16, 128>}, {transform_indices = @transform_2, window_bounds = array<i64: 16, 128>}, {transform_indices = @transform_3, window_bounds = array<i64: 8, 128>}]} {
    %c2_i32 = arith.constant 2 : i32
    %0 = arith.muli %arg0, %c2_i32 : i32
    %1 = arith.addi %0, %arg1 : i32
    %c0_i32 = arith.constant 0 : i32
    %2 = arith.cmpi eq, %arg1, %c0_i32 : i32
    %3 = arith.extui %2 : i1 to i32
    %c0_i32_0 = arith.constant 0 : i32
    %4 = arith.cmpi ne, %3, %c0_i32_0 : i32
    scf.if %4 {
      %cst_11 = arith.constant 0.000000e+00 : f32
      %34 = vector.broadcast %cst_11 : f32 to vector<8x128xf32>
      %c0_12 = arith.constant 0 : index
      %c0_13 = arith.constant 0 : index
      %35 = vector.load %arg6[%c0_12, %c0_13] : memref<8x128xf32, #tpu.memory_space<vmem>>, vector<8x128xf32>
      tpu.vector_store %arg6[%c0_12, %c0_13], %34 {strides = array<i32>} : memref<8x128xf32, #tpu.memory_space<vmem>>, vector<8x128xf32>,
    } else {
    }
    %c0 = arith.constant 0 : index
    %c0_1 = arith.constant 0 : index
    %5 = vector.load %arg2[%c0, %c0_1] : memref<16x256xf32, #tpu.memory_space<vmem>>, vector<16x256xf32>
    %6 = vector.extract_strided_slice %5 {offsets = [0, 0], sizes = [16, 128], strides = [1, 1]} : vector<16x256xf32> to vector<16x128xf32>
    %7 = vector.extract_strided_slice %5 {offsets = [0, 128], sizes = [16, 128], strides = [1, 1]} : vector<16x256xf32> to vector<16x128xf32>
    %c0_2 = arith.constant 0 : index
    %c0_3 = arith.constant 0 : index
    %8 = vector.load %arg3[%c0_2, %c0_3] : memref<16x128xf32, #tpu.memory_space<vmem>>, vector<16x128xf32>
    %c0_4 = arith.constant 0 : index
    %c0_5 = arith.constant 0 : index
    %9 = vector.load %arg4[%c0_4, %c0_5] : memref<16x128xf32, #tpu.memory_space<vmem>>, vector<16x128xf32>
    %10 = tpu.reciprocal %9 {approx = true} : vector<16x128xf32> -> vector<16x128xf32>
    %11 = arith.mulf %9, %10 : vector<16x128xf32>
    %cst = arith.constant 2.000000e+00 : f32
    %12 = vector.broadcast %cst : f32 to vector<16x128xf32>
    %13 = arith.subf %12, %11 : vector<16x128xf32>
    %14 = arith.mulf %10, %13 : vector<16x128xf32>
    %15 = arith.subf %6, %8 : vector<16x128xf32>
    %16 = arith.mulf %15, %14 : vector<16x128xf32>
    %17 = arith.mulf %16, %16 : vector<16x128xf32>
    %cst_6 = arith.constant -5.000000e-01 : f32
    %18 = vector.broadcast %cst_6 : f32 to vector<16x128xf32>
    %19 = arith.mulf %18, %17 : vector<16x128xf32>
    %20 = math.log %9 : vector<16x128xf32>
    %21 = arith.subf %19, %20 : vector<16x128xf32>
    %cst_7 = arith.constant 0.918938517 : f32
    %22 = vector.broadcast %cst_7 : f32 to vector<16x128xf32>
    %23 = arith.subf %21, %22 : vector<16x128xf32>
    %24 = arith.mulf %23, %7 : vector<16x128xf32>
    %c3_i32 = arith.constant 3 : i32
    %25 = arith.cmpi sge, %1, %c3_i32 : i32
    %true = arith.constant true
    %26 = arith.xori %25, %true : i1
    %27 = arith.extui %26 : i1 to i32
    %c0_i32_8 = arith.constant 0 : i32
    %28 = arith.cmpi ne, %27, %c0_i32_8 : i32
    scf.if %28 {
      %c0_11 = arith.constant 0 : index
      %c0_12 = arith.constant 0 : index
      %34 = vector.load %arg6[%c0_11, %c0_12] : memref<8x128xf32, #tpu.memory_space<vmem>>, vector<8x128xf32>
      %35 = vector.extract_strided_slice %24 {offsets = [0, 0], sizes = [8, 128], strides = [1, 1]} : vector<16x128xf32> to vector<8x128xf32>
      %36 = vector.extract_strided_slice %24 {offsets = [8, 0], sizes = [8, 128], strides = [1, 1]} : vector<16x128xf32> to vector<8x128xf32>
      %37 = arith.addf %35, %36 : vector<8x128xf32>
      %38 = arith.addf %34, %37 : vector<8x128xf32>
      %c0_13 = arith.constant 0 : index
      %c0_14 = arith.constant 0 : index
      %39 = vector.load %arg6[%c0_13, %c0_14] : memref<8x128xf32, #tpu.memory_space<vmem>>, vector<8x128xf32>
      tpu.vector_store %arg6[%c0_13, %c0_14], %38 {strides = array<i32>} : memref<8x128xf32, #tpu.memory_space<vmem>>, vector<8x128xf32>,
    } else {
    }
    %29 = arith.extui %25 : i1 to i32
    %c0_i32_9 = arith.constant 0 : i32
    %30 = arith.cmpi ne, %29, %c0_i32_9 : i32
    scf.if %30 {
      %c16_i32 = arith.constant 16 : i32
      %34 = arith.muli %1, %c16_i32 : i32
      %35 = tpu.iota {dimensions = array<i32: 0>} : vector<16x128xi32>
      %36 = vector.broadcast %34 : i32 to vector<16x128xi32>
      %37 = arith.addi %36, %35 : vector<16x128xi32>
      %c0_11 = arith.constant 0 : index
      %c0_12 = arith.constant 0 : index
      %38 = vector.load %arg6[%c0_11, %c0_12] : memref<8x128xf32, #tpu.memory_space<vmem>>, vector<8x128xf32>
      %c60_i32 = arith.constant 60 : i32
      %39 = vector.broadcast %c60_i32 : i32 to vector<16x128xi32>
      %40 = arith.cmpi slt, %37, %39 : vector<16x128xi32>
      %cst_13 = arith.constant 0.000000e+00 : f32
      %41 = vector.broadcast %cst_13 : f32 to vector<16x128xf32>
      %42 = arith.select %40, %24, %41 : vector<16x128xi1>, vector<16x128xf32>
      %43 = vector.extract_strided_slice %42 {offsets = [0, 0], sizes = [8, 128], strides = [1, 1]} : vector<16x128xf32> to vector<8x128xf32>
      %44 = vector.extract_strided_slice %42 {offsets = [8, 0], sizes = [8, 128], strides = [1, 1]} : vector<16x128xf32> to vector<8x128xf32>
      %45 = arith.addf %43, %44 : vector<8x128xf32>
      %46 = arith.addf %38, %45 : vector<8x128xf32>
      %c0_14 = arith.constant 0 : index
      %c0_15 = arith.constant 0 : index
      %47 = vector.load %arg6[%c0_14, %c0_15] : memref<8x128xf32, #tpu.memory_space<vmem>>, vector<8x128xf32>
      tpu.vector_store %arg6[%c0_14, %c0_15], %46 {strides = array<i32>} : memref<8x128xf32, #tpu.memory_space<vmem>>, vector<8x128xf32>,
    } else {
    }
    %c1_i32 = arith.constant 1 : i32
    %31 = arith.cmpi eq, %arg1, %c1_i32 : i32
    %32 = arith.extui %31 : i1 to i32
    %c0_i32_10 = arith.constant 0 : i32
    %33 = arith.cmpi ne, %32, %c0_i32_10 : i32
    scf.if %33 {
      %c0_11 = arith.constant 0 : index
      %c0_12 = arith.constant 0 : index
      %34 = vector.load %arg6[%c0_11, %c0_12] : memref<8x128xf32, #tpu.memory_space<vmem>>, vector<8x128xf32>
      %35 = vector.shape_cast %34 : vector<8x128xf32> to vector<1x8x128xf32>
      %cst_13 = arith.constant dense<0.000000e+00> : vector<1xf32>
      %36 = vector.multi_reduction <add>, %35, %cst_13 [1, 2] : vector<1x8x128xf32> to vector<1xf32>
      %37 = vector.shape_cast %36 : vector<1xf32> to vector<1x1x1xf32>
      %38 = vector.extract %37[0, 0, 0] : f32 from vector<1x1x1xf32>
      %39 = vector.broadcast %38 : f32 to vector<8x128xf32>
      %c0_14 = arith.constant 0 : index
      %c0_15 = arith.constant 0 : index
      %40 = vector.load %arg5[%c0_14, %c0_15] : memref<8x128xf32, #tpu.memory_space<vmem>>, vector<8x128xf32>
      tpu.vector_store %arg5[%c0_14, %c0_15], %39 {strides = array<i32>} : memref<8x128xf32, #tpu.memory_space<vmem>>, vector<8x128xf32>,
    } else {
    }
    return
  }
  func.func @transform_0(%arg0: i32, %arg1: i32) -> (i32, i32) {
    %c2_i32 = arith.constant 2 : i32
    %0 = arith.muli %arg0, %c2_i32 : i32
    %1 = arith.addi %0, %arg1 : i32
    %c3_i32 = arith.constant 3 : i32
    %2 = arith.minsi %1, %c3_i32 : i32
    %c0_i32 = arith.constant 0 : i32
    %c0_i32_0 = arith.constant 0 : i32
    return %2, %c0_i32 : i32, i32
  }
  func.func @transform_1(%arg0: i32, %arg1: i32) -> (i32, i32) {
    %c2_i32 = arith.constant 2 : i32
    %0 = arith.muli %arg0, %c2_i32 : i32
    %1 = arith.addi %0, %arg1 : i32
    %c3_i32 = arith.constant 3 : i32
    %2 = arith.minsi %1, %c3_i32 : i32
    %c0_i32 = arith.constant 0 : i32
    %c0_i32_0 = arith.constant 0 : i32
    return %2, %c0_i32 : i32, i32
  }
  func.func @transform_2(%arg0: i32, %arg1: i32) -> (i32, i32) {
    %c2_i32 = arith.constant 2 : i32
    %0 = arith.muli %arg0, %c2_i32 : i32
    %1 = arith.addi %0, %arg1 : i32
    %c3_i32 = arith.constant 3 : i32
    %2 = arith.minsi %1, %c3_i32 : i32
    %c0_i32 = arith.constant 0 : i32
    %c0_i32_0 = arith.constant 0 : i32
    return %2, %c0_i32 : i32, i32
  }
  func.func @transform_3(%arg0: i32, %arg1: i32) -> (i32, i32) {
    %c0_i32 = arith.constant 0 : i32
    %c0_i32_0 = arith.constant 0 : i32
    return %arg0, %c0_i32 : i32, i32
  }
}

</mosaic_0001>

<bundles_post_ra>
// kernel: tpu_custom_call.1
= control target key start
LH: loop header
LB: loop body
LE: loop exit
PB: predicated region body
PF: predicated region fallthrough
CT: control target
= control target key end

     0   :  { %s1217_s0 = inlined_call_operand.hbm [shape: f32[60,256], index: 0, kind: input, shape index: {}]   ;;  %s1218_s1 = inlined_call_operand.hbm [shape: f32[60,128], index: 1, kind: input, shape index: {}]   ;;  %s1219_s2 = inlined_call_operand.hbm [shape: f32[60,128], index: 2, kind: input, shape index: {}]   ;;  %s1220_s3 = inlined_call_operand.hbm [shape: f32[16,128], index: 3, kind: output, shape index: {}]  }
   0x1   :  { %1228 = sst [smem:[#allocation22_spill]] %s1218_s1 }
   0x2   :  { %1229 = sst [smem:[#allocation23_spill]] %s1219_s2 }
   0x3   :  { %8 = vsyncpa [#allocation4], 0 }
   0x4   :  { %10 = vsyncpa [#allocation4 + $0x1], 0 }
   0x5   :  { %11 = vsyncpa [#allocation7], 0 }
   0x6   :  { %13 = vsyncpa [#allocation7 + $0x1], 0 }
   0x7   :  { %14 = vsyncpa [#allocation5], 0 }
   0x8   :  { %16 = vsyncpa [#allocation5 + $0x1], 0  ;;  %s974_s12 = smov 0   ;;  %s976_s13 = smov 0  }
   0x9   :  { %s978_s14 = smov 0   ;;  %s980_s15 = smov 0  }
   0xa   :  { %s982_s16 = smov 0   ;;  %s984_s17 = smov 0  }
   0xb   :  { %s986_s18 = smov 0   ;;  %s988_s19 = smov 0  }
   0xc   :  { %s990_s20 = smov 0   ;;  %s992_s21 = smov 0  }
   0xd   :  { %s994_s22 = smov 0  }
   0xe LB: > { %1230 = sst [smem:[#allocation13_spill]] %s915_s14  ;;  %s1030_s23 = sadd.s32 4294967295, %s947_s22   ;;  %s947_s22 = sphi %s994_s22, %s22_s22   ;;  %s943_s21 = sphi %s992_s21, %s1255_s21   ;;  %s939_s20 = sphi %s990_s20, %s1254_s20   ;;  %s935_s19 = sphi %s988_s19, %s1253_s19   ;;  %s931_s18 = sphi %s986_s18, %s1252_s18   ;;  %s927_s17 = sphi %s984_s17, %s1251_s17   ;;  %s923_s16 = sphi %s982_s16, %s1259_s16   ;;  %s919_s15 = sphi %s980_s15, %s1258_s15   ;;  %s915_s14 = sphi %s978_s14, %s1249_s14   ;;  %s911_s13 = sphi %s976_s13, %s1257_s13   ;;  %s907_s12 = sphi %s974_s12, %s1256_s12  }
   0xf   : > { %1231 = sst [smem:[#allocation14_spill]] %s927_s17  ;;  %s561_s24 = sadd.s32 4294967294, %s947_s22  }
  0x10   : > { %1232 = sst [smem:[#allocation15_spill]] %s939_s20  ;;  %s31_s25 = sadd.s32 1, %s939_s20 }
  0x11   : > { %1233 = sst [smem:[#allocation16_spill]] %s943_s21  ;;  %s34_s26 = sadd.s32 1, %s943_s21 }
  0x12   : > { %p32_p0 = scmp.ge.s32.totalorder %s31_s25, 2  ;;  %s562_s27 = sshll.u32 %s943_s21, 1 }
  0x13   : > { %s39_s28 = sadd.s32 %s939_s20, %s562_s27  ;;  %s49_s29 = sadd.s32 1, %s927_s17 }
  0x14   : > { %s1261_s25 = smov (%p32_p0, %s31_s25), 0  ;;  %s1263_s26 = smov (!%p32_p0, %s34_s26), %s943_s21 }
  0x15   : > { %1234 = sst [smem:[#allocation17_spill]] %s1261_s25  ;;  %p40_p1 = scmp.lt.s32.totalorder %s39_s28, 3 }
  0x16   : > { %p56_p2 = scmp.ne.s32.totalorder %s927_s17, %s923_s16  ;;  %p36_p3 = scmp.ge.s32.totalorder %s1263_s26, 2 }
  0x17   : > { %p57_p4 = scmp.eq.s32.totalorder %s947_s22, 0  ;;  %s1265_s28 = smov (!%p40_p1, %s39_s28), 3 }
  0x18   : > { %s1267_s26 = smov (%p36_p3, %s1263_s26), 0  ;;  %p62_p6 = scmp.ne.s32.totalorder %s923_s16, %s919_s15 }
  0x19   : > { %1235 = sst [smem:[#allocation18_spill]] %s1267_s26  ;;  %p1048_p5 = por %p57_p4, %p56_p2 }
  0x1a   : > { %s563_s4 = sshll.u32 %s1267_s26, 1  ;;  %p63_p7 = scmp.eq.s32.totalorder %s1030_s23, 0 }
  0x1b   : > { %s43_s5 = sadd.s32 %s563_s4, %s1261_s25  ;;  %s140_s6 = ssub.s32 %s943_s21, %s1267_s26 }
  0x1c   : > { %p44_p8 = scmp.lt.s32.totalorder %s43_s5, 3  ;;  %p1059_p9 = por %p63_p7, %p62_p6 }
  0x1d   : > { %p141_p10 = scmp.eq.s32.totalorder %s140_s6, 0  ;;  %s143_s8 = sadd.s32 1, %s915_s14 }
  0x1e   : > { %s1269_s5 = smov (!%p44_p8, %s43_s5), 3  ;;  %p153_p11 = scmp.ne.s32.totalorder %s915_s14, %s911_s13 }
  0x1f   : > { %s1065_s9 = scalar_select %p141_p10, %s915_s14, %s143_s8  }
  0x20   : > { %s46_s10 = ssub.s32 %s1265_s28, %s1269_s5  ;;  %p154_p13 = scmp.eq.s32.totalorder %s1030_s23, 3 }
  0x21   : > { %1238 = sst [smem:[#allocation19_spill]] %s1065_s9  ;;  %p47_p12 = scmp.eq.s32.totalorder %s46_s10, 0 }
  0x22   : > { %p159_p0 = scmp.ne.s32.totalorder %s911_s13, %s907_s12  ;;  %p160_p1 = scmp.eq.s32.totalorder %s561_s24, 3 }
  0x23   : > { %s1076_s11 = scalar_select %p47_p12, %s927_s17, %s49_s29  }
  0x24   : > { %p1078_p2 = por %p154_p13, %p153_p11  ;;  %p1082_p3 = por %p160_p1, %p159_p0 }
  0x25   : > { %1239 = sst [smem:[#allocation20_spill]] %s1076_s11  ;;  %p628_p4 = scmp.lt.s32.totalorder %s947_s22, 4 }
  0x26   : > { %s1241_s27 = scalar_select %p1082_p3, 1, 0 }
  0x27   : > { %s1088_s4 = sand.u32 1, %s927_s17   ;;  %s207_s5 = sand.u32 1, %s947_s22  }
  0x28   : > { %1242 = sst [smem:[#allocation21_spill]] %s1241_s27  ;;  %p1093_p6 = pnand %p628_p4, %p1048_p5 }
  0x29   : > { %s575_s24 = sshll.u32 %s1088_s4, 4  ;;  %s602_s29 = sshll.u32 %s1265_s28, 4 }
  0x2a   : > { %s1244_s1 = sld [smem:[#allocation22_spill]]  ;;  %s211_s25 = scalar_lea.vmem [#allocation6], %s575_s24 }
  0x2b   : > { %s223_s21 = sshll.u32 %s211_s25, 4  ;;  %s1102_s30 = scalar_lea.sflag [#allocation7], %s207_s5  ;;  %s224_s21 = int_to_ptr.vmem [resolvable:$true] %s223_s21 }
  0x2c   : > { %s949_s11 = smov 128   ;;  %s950_s17 = smov 8  }
  0x2d   : > { %s1245_s2 = sld [smem:[#allocation23_spill]]  ;;  %s237_s10 = scalar_lea.vmem [#allocation8], %s575_s24 }
  0x2e   : > { %p583_p5 = scmp.ge.s32.totalorder %s947_s22, 1  ;;  %p257_p7 = scmp.lt.s32.totalorder %s947_s22, 5 }
  0x2f   : > { %s952_s27 = smov 16  }
  0x30   : > { %s220_s26 = scalar_lea.hbm %s1244_s1, %s602_s29  ;;  %s249_s1 = sshll.u32 %s237_s10, 4  ;;  %s250_s1 = int_to_ptr.vmem [resolvable:$true] %s249_s1 }
  0x31   : > { %s221_s20 = sshll.u32 %s220_s26, 4  ;;  %p1112_p8 = pnand %p583_p5, %p257_p7  ;;  %s222_s20 = int_to_ptr.hbm [resolvable:$true] %s221_s20 }
  0x32   : > { %620 = dma.hbm_to_vmem [thread:$0]  (!%p1093_p6), %s222_s20, 256, %s224_s21, %s1102_s30, %s949_s11, %s949_s11, %s950_s17  }
  0x33   : > { %s246_s8 = scalar_lea.hbm %s1245_s2, %s602_s29  ;;  %s570_s20 = sshll.u32 %s1088_s4, 5 }
  0x34   : > { %s247_s25 = sshll.u32 %s246_s8, 4  ;;  %s601_s21 = sshll.u32 %s1265_s28, 5  ;;  %s248_s25 = int_to_ptr.hbm [resolvable:$true] %s247_s25 }
  0x35   : > { %s194_s9 = scalar_lea.hbm %s1217_s0, %s601_s21  ;;  %s184_s24 = scalar_lea.vmem [#allocation3], %s570_s20 }
  0x36   : > { %s197_s29 = sshll.u32 %s184_s24, 4  ;;  %s195_s8 = sshll.u32 %s194_s9, 4  ;;  %s198_s29 = int_to_ptr.vmem [resolvable:$true] %s197_s29  ;;  %s196_s8 = int_to_ptr.hbm [resolvable:$true] %s195_s8 }
  0x37   : > { %s181_s10 = scalar_lea.sflag [#allocation4], %s1088_s4  ;;  %s951_s2 = smov 256  }
  0x38   : > { %617 = dma.hbm_to_vmem [thread:$0]  (!%p1093_p6), %s196_s8, 512, %s198_s29, %s181_s10, %s951_s2, %s951_s2, %s952_s27  }
  0x39   : > { %623 = dma.hbm_to_vmem [thread:$0]  (!%p1093_p6), %s248_s25, 256, %s250_s1, %s1102_s30, %s949_s11, %s949_s11, %s950_s17  }
  0x3a   : > { %261 = sbr.rel (%p1112_p8) target bundleno = 336 (0x150), region = 32  ;;  %s263_s28 = sand.u32 (!%p1112_p8), 1, %s923_s16  }
  0x3b   : > { %s584_s5 = sshll.u32 (!%p1112_p8), %s263_s28, 5  ;;  %s264_s21 = scalar_lea.sflag (!%p1112_p8), [#allocation4], %s263_s28 }
  0x3c   : > { %s1130_s20 = scalar_lea.vmem (!%p1112_p8), [#allocation3], %s584_s5 }
  0x3f   : > { %894 = dma.done.wait (%p1059_p9), %s264_s21, 512  }
  0x40   : > { %896 = vsyncadd (%p1059_p9), %s264_s21, 4294966784  ;;  %s273_s2 = sand.u32 1, %s1030_s23   ;;  %s585_s27 = sshll.u32 %s263_s28, 4 }
  0x41   : > { %s274_s1 = scalar_lea.sflag [#allocation7], %s273_s2  ;;  %s277_s17 = scalar_lea.vmem [#allocation6], %s585_s27 }
  0x42   : > { %898 = dma.done.wait (%p1059_p9), %s274_s1, 512  }
  0x43   : > { %900 = vsyncadd (%p1059_p9), %s274_s1, 4294966784  ;;  %s318_s11 = sand.u32 1, %s911_s13   ;;  %s588_s6 = sshll.u32 %s935_s19, 1 }
  0x44   : > { %s1144_s4 = sshll.u32 %s318_s11, 3  ;;  %s1148_s30 = sadd.s32 %s931_s18, %s588_s6 }
  0x45   : > { %s287_s23 = scalar_lea.vmem [#allocation8], %s585_s27  ;;  %s320_s25 = scalar_lea.vmem [#allocation9], %s1144_s4 }
  0x46   : > { %p589_p10 = scmp.ne.s32.totalorder %s931_s18, 0 }
  0x48   : > { %341 = sbr.rel (%p589_p10) target bundleno = 79 (0x4f), region = 48 }
  0x4d   : > { %v953_v0 = vmov 0.0  }
  0x4e   : > { %342 = vst [vmem:[#allocation2] sm:$0xff] %v953_v0 }
  0x4f PF: > { %v349_v1 = vld [vmem:[%s287_s23] sm:$0xff]  ;;  %v350_v2 = vld [vmem:[%s287_s23 + $0x8] sm:$0xff]  ;;  %p592_p9 = scmp.ge.s32.totalorder %s1148_s30, 3 }
  0x50   : > { %723 = vrcp.f32 %v349_v1  ;;  %v343_v4 = vld [vmem:[%s1130_s20] sm:$0xff]  ;;  %v345_v7 = vld [vmem:[%s1130_s20 + $0x10] sm:$0xff]  ;;  %v348_v8 = vld [vmem:[%s277_s17 + $0x8] sm:$0xff] }
  0x51   : > { %725 = vrcp.f32 %v350_v2  ;;  %v347_v5 = vld [vmem:[%s277_s17] sm:$0xff]  ;;  %v360_v14 = vsub.f32 %v345_v7, %v348_v8  ;;  %v344_v28 = vld [vmem:[%s1130_s20 + $0x8] sm:$0xff]  ;;  %v346_v30 = vld [vmem:[%s1130_s20 + $0x18] sm:$0xff] }
  0x52   : > { %727 = vlog2.f32 %v349_v1  ;;  %v359_v12 = vsub.f32 %v343_v4, %v347_v5 }
  0x53   : > { %729 = vlog2.f32 %v350_v2 }
  0x56   : > { %v724_v3 = vpop.eup %723 }
  0x57   : > { %v726_v6 = vpop.eup %725  ;;  %v353_v9 = vmul.f32 %v724_v3, %v349_v1 }
  0x58   : > { %v354_v10 = vmul.f32 %v726_v6, %v350_v2  ;;  %v728_v16 = vpop.eup %727 }
  0x59   : > { %v355_v11 = vsub.f32 2.0, %v353_v9  ;;  %v730_v18 = vpop.eup %729  ;;  %v368_v22 = vmul.f32 0.6931472, %v728_v16 }
  0x5a   : > { %v356_v13 = vsub.f32 2.0, %v354_v10  ;;  %v370_v24 = vmul.f32 0.6931472, %v730_v18 }
  0x5b   : > { %v357_v15 = vmul.f32 %v724_v3, %v355_v11 }
  0x5c   : > { %v358_v17 = vmul.f32 %v726_v6, %v356_v13 }
  0x5d   : > { %v361_v19 = vmul.f32 %v359_v12, %v357_v15 }
  0x5e   : > { %v362_v20 = vmul.f32 %v360_v14, %v358_v17 }
  0x5f   : > { %v363_v21 = vmul.f32 %v361_v19, %v361_v19 }
  0x60   : > { %v364_v23 = vmul.f32 %v362_v20, %v362_v20 }
  0x61   : > { %v365_v25 = vmul.f32 -0.5, %v363_v21 }
  0x62   : > { %v366_v26 = vmul.f32 -0.5, %v364_v23 }
  0x63   : > { %v371_v27 = vsub.f32 %v365_v25, %v368_v22 }
  0x64   : > { %v372_v29 = vsub.f32 %v366_v26, %v370_v24  ;;  %381 = sbr.rel (%p592_p9) target bundleno = 111 (0x6f), region = 52 }
  0x65   : > { %v590_v31 = vadd.f32 -0.9189385, %v371_v27 }
  0x66   : > { %v591_v32 = vadd.f32 -0.9189385, %v372_v29 }
  0x67   : > { %v375_v33 = vmul.f32 %v590_v31, %v344_v28 }
  0x68   : > { %v376_v34 = vmul.f32 %v591_v32, %v346_v30 }
  0x69   : > { %v382_v35 = vld [vmem:[#allocation2] sm:$0xff] }
  0x6a   : > { %v383_v36 = vadd.f32 %v376_v34, %v375_v33 }
  0x6c   : > { %v384_v37 = vadd.f32 %v383_v36, %v382_v35 }
  0x6e   : > { %385 = vst [vmem:[#allocation2] sm:$0xff] %v384_v37 }
  0x6f PF: > { %p593_p11 = scmp.lt.s32.totalorder %s1148_s30, 3 }
  0x70   : > { %s594_s7 = sshll.u32 (!%p593_p11), %s1148_s30, 4 }
  0x71   : > { %388 = sbr.rel (%p593_p11) target bundleno = 133 (0x85), region = 56 }
  0x76   : > { %v390_v38 = vlaneseq  ;;  %v393_v39 = vstv %s594_s7  ;;  %v396_v45 = vld [vmem:[#allocation2] sm:$0xff] }
  0x78   : > { %v391_v40 = vshrl.u32 %v390_v38, 7 }
  0x7a   : > { %v392_v41 = vadd.s32 8, %v391_v40  ;;  %v394_v42 = vadd.s32 %v393_v39, %v391_v40 }
  0x7c   : > { %v395_v43 = vadd.s32 %v393_v39, %v392_v41  ;;  %vm397_vm0 = vcmp.lt.s32.totalorder %v394_v42, 60 }
  0x7d   : > { %v399_v44 = vsel %vm397_vm0, %v375_v33, 0.0 }
  0x7e   : > { %vm398_vm1 = vcmp.lt.s32.totalorder %v395_v43, 60 }
  0x7f   : > { %v400_v46 = vsel %vm398_vm1, %v376_v34, 0.0 }
  0x80   : > { %v401_v47 = vadd.f32 %v400_v46, %v399_v44 }
  0x82   : > { %v402_v48 = vadd.f32 %v401_v47, %v396_v45 }
  0x84   : > { %403 = vst [vmem:[#allocation2] sm:$0xff] %v402_v48 }
  0x85 PF: > { %p595_p12 = scmp.ne.s32.totalorder %s931_s18, 1 }
  0x87   : > { %407 = sbr.rel (%p595_p12) target bundleno = 321 (0x141), region = 60 }
  0x8c   : > { %v408_v49 = vld [vmem:[#allocation2] sm:$0xff] }
  0x8d   : > { %409 = vadd.xlane.f32.xlu0 %v408_v49 }
 0x100   : > { %v410_v50 = vpop.xlane.xlu0 %409 }
 0x101   : > { %v411_v51 = vrot.slane %v410_v50, 4 }
 0x103   : > { %v412_v52 = vadd.f32 %v411_v51, %v410_v50 }
 0x105   : > { %v413_v53 = vrot.slane %v412_v52, 2 }
 0x107   : > { %v414_v54 = vadd.f32 %v413_v53, %v412_v52 }
 0x109   : > { %v415_v55 = vrot.slane %v414_v54, 1 }
 0x10b   : > { %v416_v56 = vadd.f32 %v415_v55, %v414_v54 }
 0x10d   : > { %604 = vpush %v416_v56 }
 0x13e   : > { %s605_s26 = spop %604 }
 0x13f   : > { %v418_v57 = vstv %s605_s26 }
 0x140   : > { %419 = vst [vmem:[%s320_s25] sm:$0xff] %v418_v57 }
 0x141 PF: > { %s597_s18 = sshll.u32 %s935_s19, 3  ;;  %s433_s29 = sshll.u32 %s320_s25, 4  ;;  %s434_s29 = int_to_ptr.vmem [resolvable:$true] %s433_s29 }
 0x142   : > { %s431_s24 = scalar_lea.hbm %s1220_s3, %s597_s18  ;;  %s421_s10 = scalar_lea.sflag [#allocation5], %s318_s11 }
 0x143   : > { %s435_s8 = sshll.u32 %s431_s24, 4  ;;  %s841_s20 = scalar_lea.hbm %s1220_s3, 16  ;;  %s436_s8 = int_to_ptr.hbm [resolvable:$true] %s435_s8 }
 0x144   : > { %s835_s28 = sshra.s32 %s436_s8, 4  ;;  %s836_s28 = int_to_ptr.hbm [resolvable:$true] %s835_s28 }
 0x145   : > { %s837_s5 = scalar_lea.hbm %s836_s28, 8  ;;  %p842_p4 = scmp.lt.s32.totalorder %s836_s28, %s1220_s3 }
 0x146   : > { %p838_p13 = scmp.ne.s32.totalorder %s836_s28, %s837_s5  ;;  %p843_p6 = scmp.lt.s32.totalorder %s841_s20, %s837_s5 }
 0x148   : > { %p839_p0 = pnand %p838_p13, %p1078_p2  ;;  %p844_p5 = por %p843_p6, %p842_p4 }
 0x14a   : > { %p840_p1 = pneg %p839_p0 }
 0x14c   : > { %p845_p7 = pnand %p844_p5, %p840_p1 }
 0x14e   : > { %848 = shalt.err (!%p845_p7)
}
 0x14f   : > { %612 = dma.vmem_to_hbm [thread:$0]  (%p1078_p2), %s434_s29, 128, %s436_s8, %s421_s10  }
 0x150 PF: > { %p629_p8 = scmp.ge.s32.totalorder %s947_s22, 2  ;;  %s447_s17 = sand.u32 1, %s907_s12  }
 0x151   : > { %s448_s11 = scalar_lea.sflag [#allocation5], %s447_s17 }
 0x152   : > { %p625_p10 = pnand %p629_p8, %p1082_p3 }
 0x154   : > { %p626_p9 = pneg %p625_p10 }
 0x156   : > { %902 = dma.done.wait (%p626_p9), %s448_s11, 128  }
 0x157   : > { %904 = vsyncadd (%p626_p9), %s448_s11, 4294967168  ;;  %s22_s22 = sadd.s32 1, %s947_s22   ;;  %s1248_s4 = sld [smem:[#allocation13_spill]] }
 0x158   : > { %p19_p11 = scmp.ge.s32.totalorder %s22_s22, 6   ;;  %s1249_s14 = sld [smem:[#allocation19_spill]] }
 0x159   : > { %s1250_s6 = sld [smem:[#allocation14_spill]]  ;;  %s1256_s12 = smov %s911_s13 }
 0x15a   : > { %s1251_s17 = sld [smem:[#allocation20_spill]]  ;;  %s1258_s15 = smov %s923_s16 }
 0x15b   : > { %s1252_s18 = sld [smem:[#allocation15_spill]]  ;;  %21 = sbr.rel (!%p19_p11) target bundleno = 14 (0xe), region = 117 }
 0x15c   : > { %s1253_s19 = sld [smem:[#allocation16_spill]] }
 0x15d   : > { %s1254_s20 = sld [smem:[#allocation17_spill]]  ;;  %s1257_s13 = smov %s1248_s4 }
 0x15e   : > { %s1255_s21 = sld [smem:[#allocation18_spill]] }
 0x15f   : > { %s1259_s16 = smov %s1250_s6 }
 0x160   :  { %454 = vsyncpa [#allocation4], 1 }
 0x161   :  { %456 = vsyncpa [#allocation4 + $0x1], 1 }
 0x162   :  { %457 = vsyncpa [#allocation7], 1 }
 0x163   :  { %459 = vsyncpa [#allocation7 + $0x1], 1 }
 0x164   :  { %460 = vsyncpa [#allocation5], 1 }
 0x165   :  { %462 = vsyncpa [#allocation5 + $0x1], 1 }

</bundles_post_ra>
